<compile_context>
chip_gen: v7x
topology: tpu7x:2x2x1
jax: 0.10.0
libtpu: 0.0.40
codegen_flags: <defaults>
</compile_context>

<pallas_src>
import math

import jax
import jax.numpy as jnp
from jax.experimental import pallas as pl
from jax.experimental.pallas import tpu as pltpu


def _round_up(a, b):
    return -(-a // b) * b


# --------------------------------------------------------------------------- #
# Kernels
# --------------------------------------------------------------------------- #
def _make_const_kernel(alpha, beta):
    # alpha/beta baked in as compile-time constants (no SMEM operand).
    use_clip = beta >= 0.0  # clip form only equivalent for non-negative beta

    def kernel(x_ref, o_ref):
        x = x_ref[...]
        a = jnp.asarray(alpha, x.dtype)
        b = jnp.asarray(beta, x.dtype)
        if use_clip:
            o_ref[...] = a * (x - jnp.clip(x, -b, b))
        else:
            o_ref[...] = a * (jnp.maximum(x - b, 0) - jnp.maximum(-x - b, 0))

    return kernel


def _make_smem_kernel(use_clip):
    # scale_ref: SMEM (2,) float32 -> [alpha, beta]
    def kernel(scale_ref, x_ref, o_ref):
        x = x_ref[...]
        a = scale_ref[0].astype(x.dtype)
        b = scale_ref[1].astype(x.dtype)
        if use_clip:
            o_ref[...] = a * (x - jnp.clip(x, -b, b))
        else:
            o_ref[...] = a * (jnp.maximum(x - b, 0) - jnp.maximum(-x - b, 0))

    return kernel


# --------------------------------------------------------------------------- #
# Wrapper
# --------------------------------------------------------------------------- #
def soft_thresholding_pallas(x, alpha=0.9, beta=0.0, auto_scale=False,
                             donate_input=False):
    """Pallas TPU implementation of SoftThresholding.forward.

    x: array of any shape (e.g. NCHW). alpha/beta are python floats, or learned
    scalars when auto_scale=True (clamped exactly like the PyTorch module).
    """
    orig_shape = x.shape
    orig_dtype = x.dtype
    n = math.prod(orig_shape) if orig_shape else 1
    if n == 0:
        return x

    itemsize = jnp.dtype(orig_dtype).itemsize
    sub = max(8, 32 // itemsize)  # sublane multiple: f32->8, bf16->16, int8->32

    # ---- lane-dense layout: flatten -> (rows, TC) with TC % 128 == 0 ----
    if n % 128 == 0:
        # No-pad fast path: pick a 128-multiple divisor of n as the lane dim.
        TC = next(tc for tc in (1024, 512, 256, 128) if n % tc == 0)
        rows = n // TC
        pad = 0
    else:
        # Irregular n: pad only to the next 128-multiple (< 128 extra elems).
        TC = 128
        rows = -(-n // TC)
        pad = rows * TC - n

    # ---- generation-gated tile cap ----
    try:
        info = pltpu.get_tpu_info()
        vmem_cap = getattr(info, "vmem_capacity_bytes", 64 << 20) or (64 << 20)
    except Exception:
        vmem_cap = 64 << 20
    # <= 4 MiB per buffer; double-buffered in+out = 4x tile, keep <= vmem/4.
    tile_bytes_cap = max(sub * TC * itemsize, min(4 << 20, vmem_cap // 16))
    tr_cap = max(sub, (tile_bytes_cap // (TC * itemsize)) // sub * sub)

    if rows <= sub:
        TR = rows  # block covers full first dim (allowed even if < sublane mult)
    else:
        # Cap TR at ~half the rows so the grid has >= 2 steps: lets v7x shard
        # the "parallel" axis across its 2 TensorCores.
        half = _round_up(-(-rows // 2), sub)
        TR = max(sub, min(tr_cap, half))
    grid = (-(-rows // TR),)  # ragged final tile is masked by the pipeline
    block = pl.BlockSpec((TR, TC), lambda i: (i, 0))

    xf = x.reshape(-1)
    if pad:
        xf = jnp.pad(xf, (0, pad))
    x2d = xf.reshape(rows, TC)

    # ---- parameter handling ----
    if auto_scale:
        # mirror .clamp_(1e-5, 1) / .clamp_(1e-5)
        a_v = jnp.clip(jnp.asarray(alpha, jnp.float32).reshape(()), 1e-5, 1.0)
        b_v = jnp.maximum(jnp.asarray(beta, jnp.float32).reshape(()), 1e-5)
        scale = jnp.stack([a_v, b_v])  # (2,) f32 -> SMEM
        kernel = _make_smem_kernel(use_clip=True)  # beta clamped >= 1e-5
        in_specs = [pl.BlockSpec(memory_space=pltpu.MemorySpace.SMEM), block]
        args = (scale, x2d)
    elif isinstance(alpha, (int, float)) and isinstance(beta, (int, float)):
        kernel = _make_const_kernel(float(alpha), float(beta))
        in_specs = [block]
        args = (x2d,)
    else:
        # traced (but not auto_scale) parameters -> SMEM path, no clamping,
        # sign of beta unknown -> keep the general two-relu form.
        scale = jnp.stack([jnp.asarray(alpha, jnp.float32).reshape(()),
                           jnp.asarray(beta, jnp.float32).reshape(())])
        kernel = _make_smem_kernel(use_clip=False)
        in_specs = [pl.BlockSpec(memory_space=pltpu.MemorySpace.SMEM), block]
        args = (scale, x2d)

    io_aliases = {len(args) - 1: 0} if donate_input else {}

    out2d = pl.pallas_call(
        kernel,
        out_shape=jax.ShapeDtypeStruct((rows, TC), orig_dtype),
        grid=grid,
        in_specs=in_specs,
        out_specs=block,
        input_output_aliases=io_aliases,
        cost_estimate=pl.CostEstimate(
            flops=4 * rows * TC,
            transcendentals=0,
            bytes_accessed=2 * rows * TC * itemsize),
        compiler_params=pltpu.CompilerParams(
            dimension_semantics=("parallel",),
            vmem_limit_bytes=32 << 20),
    )(*args)

    out_flat = out2d.reshape(-1)
    if pad:
        out_flat = out_flat[:n]
    return out_flat.reshape(orig_shape)


def _reference(x, alpha, beta):
    return alpha * jnp.maximum(x - beta, 0.0) - alpha * jnp.maximum(-x - beta, 0.0)


if __name__ == "__main__":
    key = jax.random.PRNGKey(0)
    # NCHW, small shape (matches the module's typical conv-activation usage)
    x = jax.random.normal(key, (2, 4, 16, 16), dtype=jnp.float32)

    alpha, beta = 0.9, 0.1

    # constant-parameter path (alpha/beta folded into the kernel, no-pad layout)
    out = jax.block_until_ready(
        soft_thresholding_pallas(x, alpha=alpha, beta=beta, auto_scale=False))
    ref = _reference(x, alpha, beta)
    assert out.shape == x.shape and out.dtype == x.dtype
    assert jnp.allclose(out, ref, atol=1e-6, rtol=1e-6)

    # learned-parameter path (auto_scale=True -> clamped, passed via SMEM)
    out2 = jax.block_until_ready(
        soft_thresholding_pallas(x, alpha=1.5, beta=-0.2, auto_scale=True))
    ref2 = _reference(x, 1.0, 1e-5)  # clamp(1.5,1e-5,1)=1.0 ; clamp(-0.2,min=1e-5)=1e-5
    assert jnp.allclose(out2, ref2, atol=1e-6, rtol=1e-6)

    # irregular size exercising the (tiny) pad path
    x3 = jax.random.normal(jax.random.PRNGKey(1), (3, 5, 7), dtype=jnp.float32)
    out3 = jax.block_until_ready(
        soft_thresholding_pallas(x3, alpha=0.7, beta=0.05))
    assert jnp.allclose(out3, _reference(x3, 0.7, 0.05), atol=1e-6, rtol=1e-6)

    print("KERNEL_OK")
</pallas_src>

<mosaic_0001>
module attributes {stable_mosaic.version = 11 : i64} {
  func.func @kernel(%arg0: i32, %arg1: memref<2x1024xf32, #tpu.memory_space<vmem>>, %arg2: memref<2x1024xf32, #tpu.memory_space<vmem>>) attributes {dimension_semantics = [#tpu.dimension_semantics<parallel>], iteration_bounds = array<i64: 1>, scalar_prefetch = 0 : i64, scratch_operands = 0 : i64, tpu.core_type = #tpu.core_type<tc>, window_params = [{transform_indices = @transform_0, window_bounds = array<i64: 2, 1024>}, {transform_indices = @transform_1, window_bounds = array<i64: 2, 1024>}]} {
    %c0 = arith.constant 0 : index
    %c0_0 = arith.constant 0 : index
    %0 = vector.load %arg1[%c0, %c0_0] : memref<2x1024xf32, #tpu.memory_space<vmem>>, vector<2x1024xf32>
    %cst = arith.constant 0.000000e+00 : f32
    %cst_1 = arith.constant 1.000000e-01 : f32
    %1 = arith.subf %cst, %cst_1 : f32
    %cst_2 = arith.constant 1.000000e-01 : f32
    %2 = vector.broadcast %1 : f32 to vector<2x1024xf32>
    %3 = arith.maximumf %2, %0 : vector<2x1024xf32>
    %4 = vector.broadcast %cst_2 : f32 to vector<2x1024xf32>
    %5 = arith.minimumf %4, %3 : vector<2x1024xf32>
    %6 = arith.subf %0, %5 : vector<2x1024xf32>
    %cst_3 = arith.constant 0.899999976 : f32
    %7 = vector.broadcast %cst_3 : f32 to vector<2x1024xf32>
    %8 = arith.mulf %7, %6 : vector<2x1024xf32>
    %c0_4 = arith.constant 0 : index
    %c0_5 = arith.constant 0 : index
    %9 = vector.load %arg2[%c0_4, %c0_5] : memref<2x1024xf32, #tpu.memory_space<vmem>>, vector<2x1024xf32>
    tpu.vector_store %arg2[%c0_4, %c0_5], %8 {strides = array<i32>} : memref<2x1024xf32, #tpu.memory_space<vmem>>, vector<2x1024xf32>,
    return
  }
  func.func @transform_0(%arg0: i32) -> (i32, i32) {
    %c0_i32 = arith.constant 0 : i32
    %c0_i32_0 = arith.constant 0 : i32
    return %arg0, %c0_i32 : i32, i32
  }
  func.func @transform_1(%arg0: i32) -> (i32, i32) {
    %c0_i32 = arith.constant 0 : i32
    %c0_i32_0 = arith.constant 0 : i32
    return %arg0, %c0_i32 : i32, i32
  }
}

</mosaic_0001>

<bundles_post_ra>
// kernel: tpu_custom_call.1
= control target key start
LH: loop header
LB: loop body
LE: loop exit
PB: predicated region body
PF: predicated region fallthrough
CT: control target
= control target key end

     0   :  { %6 = vsyncpa [#allocation3], 0  ;;  %s136_s0 = inlined_call_operand.hbm [shape: f32[2,1024], index: 0, kind: input, shape index: {}]   ;;  %s137_s1 = inlined_call_operand.hbm [shape: f32[2,1024], index: 1, kind: output, shape index: {}]  }
   0x1   :  { %7 = vsyncpa [#allocation4], 0  ;;  %s100_s6 = smov [#allocation2]   ;;  %s52_s10 = scalar_lea.hbm %s136_s0, 256 }
   0x2   :  { %s14_s7 = sshll.u32 %s100_s6, 4  ;;  %p53_p0 = scmp.ne.s32.totalorder %s136_s0, %s52_s10  ;;  %s15_s7 = int_to_ptr.vmem [resolvable:$true] %s14_s7 }
   0x3   :  { %p56_p1 = scmp.lt.u32.totalorder %s52_s10, %s136_s0 }
   0x5   :  { %p58_p2 = pnand %p56_p1, %p53_p0 }
   0x7   :  { %61 = shalt.err (!%p58_p2)
}
   0x8   :  { %s62_s15 = scalar_lea.vmem %s15_s7, 256  ;;  %p67_p4 = scmp.lt.s32.totalorder %s15_s7, %s15_s7 }
   0x9   :  { %p63_p3 = scmp.ne.s32.totalorder %s15_s7, %s62_s15  ;;  %p68_p5 = scmp.lt.s32.totalorder %s62_s15, %s62_s15 }
   0xb   :  { %p69_p6 = por %p68_p5, %p67_p4 }
   0xd   :  { %p70_p7 = pnand %p69_p6, %p63_p3 }
   0xf   :  { %73 = shalt.err (!%p70_p7)
}
  0x10   :  { %17 = dma.hbm_to_vmem [thread:$0]  %s136_s0, 256, %s15_s7, [#allocation3]  }
  0x11   :  { %96 = dma.done.wait [#allocation3], 256  }
  0x12   :  { %97 = vsyncadd [#allocation3], 4294967040  ;;  %v21_v0 = vld [vmem:[#allocation2] sm:$0xff]  ;;  %v22_v1 = vld [vmem:[#allocation2 + $0x8] sm:$0xff]  ;;  %s101_s18 = smov [#allocation5]  }
  0x13   :  { %v48_v2 = vclamps-f32 %v21_v0, 0.1  ;;  %v49_v3 = vclamps-f32 %v22_v1, 0.1  ;;  %s39_s19 = sshll.u32 %s101_s18, 4  ;;  %s40_s19 = int_to_ptr.vmem [resolvable:$true] %s39_s19 }
  0x14   :  { %s74_s20 = scalar_lea.vmem %s40_s19, 256  ;;  %p79_p9 = scmp.lt.s32.totalorder %s40_s19, %s40_s19 }
  0x15   :  { %v27_v4 = vsub.f32 %v21_v0, %v48_v2  ;;  %v28_v5 = vsub.f32 %v22_v1, %v49_v3  ;;  %p75_p8 = scmp.ne.s32.totalorder %s40_s19, %s74_s20  ;;  %p80_p10 = scmp.lt.s32.totalorder %s74_s20, %s74_s20 }
  0x17   :  { %v29_v6 = vmul.f32 0.9, %v27_v4  ;;  %v30_v7 = vmul.f32 0.9, %v28_v5  ;;  %p81_p11 = por %p80_p10, %p79_p9 }
  0x19   :  { %31 = vst [vmem:[#allocation5] sm:$0xff] %v29_v6  ;;  %32 = vst [vmem:[#allocation5 + $0x8] sm:$0xff] %v30_v7  ;;  %p82_p12 = pnand %p81_p11, %p75_p8 }
  0x1b   :  { %85 = shalt.err (!%p82_p12)
}
  0x1c   :  { %s86_s22 = scalar_lea.hbm %s137_s1, 256 }
  0x1d   :  { %p87_p13 = scmp.ne.s32.totalorder %s137_s1, %s86_s22  ;;  %p90_p0 = scmp.lt.u32.totalorder %s86_s22, %s137_s1 }
  0x1f   :  { %p92_p1 = pnand %p90_p0, %p87_p13 }
  0x21   :  { %95 = shalt.err (!%p92_p1)
}
  0x22   :  { %42 = dma.vmem_to_hbm [thread:$0]  %s40_s19, 256, %s137_s1, [#allocation4]  }
  0x23   :  { %98 = dma.done.wait [#allocation4], 256  }
  0x24   :  { %99 = vsyncadd [#allocation4], 4294967040 }
  0x25   :  { %46 = vsyncpa [#allocation3], 1 }
  0x26   :  { %47 = vsyncpa [#allocation4], 1 }

</bundles_post_ra>
